<compile_context>
chip_gen: v5e
topology: v5e:2x2
jax: 0.10.0
libtpu: 0.0.40
codegen_flags: <defaults>
</compile_context>

<pallas_src>
import functools
import numpy as np
import jax
import jax.numpy as jnp
from jax.experimental import pallas as pl
from jax.experimental.pallas import tpu as pltpu


# ------------------------- roll-direction probe (cached) ------------------------

@functools.lru_cache(maxsize=None)
def _detect_roll_shifts(hidden_size):
    """pltpu.roll shifts (f, g, o) that bring gate blocks 1/2/3 of a (Bp, 4H) gate
    vector down to lanes [0:H].  Probed at the kernel's actual lane width (4H) and
    cached per H, so it costs one tiny pallas_call per process per hidden size."""
    H = hidden_size
    G = 4 * H

    def probe_kernel(x_ref, o_ref):
        o_ref[...] = pltpu.roll(x_ref[...], 1, axis=1)

    x = jnp.broadcast_to(jnp.arange(G, dtype=jnp.float32), (8, G))
    r = pl.pallas_call(
        probe_kernel,
        out_shape=jax.ShapeDtypeStruct((8, G), jnp.float32),
        in_specs=[pl.BlockSpec(memory_space=pltpu.MemorySpace.VMEM)],
        out_specs=pl.BlockSpec(memory_space=pltpu.MemorySpace.VMEM),
    )(x)
    if int(np.asarray(r)[0, 0]) == G - 1:   # jnp.roll convention: out[i] = in[i - s]
        return 3 * H, 2 * H, H
    return H, 2 * H, 3 * H                  # opposite convention: out[i] = in[i + s]


# ------------------------- Pallas kernel ----------------------------------------

def make_lstm_fc_kernel(num_layers, seq_len, hidden_size, batch_pad, roll_shifts):
    H, T, L, Bp = hidden_size, seq_len, num_layers, batch_pad
    G = 4 * H
    s_f, s_g, s_o = roll_shifts

    def kernel(*refs):
        # refs: x_flat (T*Bp, I0) bf16,
        #       layer 0: w_ih0_T (I0, G) bf16, w_hh0_pad (G, G) bf16, b0 (1, G) f32,
        #       layer l>0: w_fused_l (2G, G) bf16, b_l (1, G) f32,
        #       fc_w_pad (G, Cp) bf16, fc_b_pad (1, Cp) f32, out (Bp, Cp) f32
        x_ref = refs[0]
        w_ih0_ref, w_hh0_ref, b0_ref = refs[1], refs[2], refs[3]
        fused_refs = refs[4:4 + 2 * (L - 1)]
        fc_w_ref = refs[4 + 2 * (L - 1)]
        fc_b_ref = refs[5 + 2 * (L - 1)]
        out_ref = refs[6 + 2 * (L - 1)]

        # Hoisted loop-invariant loads.
        w_hh0 = w_hh0_ref[...]
        w_fused = [fused_refs[2 * (l - 1)][...] for l in range(1, L)]
        bias = [b0_ref[...]] + [fused_refs[2 * (l - 1) + 1][...] for l in range(1, L)]

        # Gate layout along lanes: [i | f | g | o], H lanes each.  The g-block uses
        # tanh(x) = 2*sigmoid(2x) - 1 so the whole (Bp, G) vreg needs only ONE sigmoid.
        lane = jax.lax.broadcasted_iota(jnp.int32, (Bp, G), 1)
        g_block = (lane // H) == 2
        pre_scale = jnp.where(g_block, 2.0, 1.0).astype(jnp.float32)   # also post-mul
        post_sub = jnp.where(g_block, 1.0, 0.0).astype(jnp.float32)

        def cell(g_pre, c_prev):
            s = jax.nn.sigmoid(g_pre * pre_scale)        # single EUP push
            act = s * pre_scale - post_sub               # g-block -> tanh (VPU fix-up)
            f_al = pltpu.roll(act, s_f, axis=1)          # f-gate -> lanes [0:H]
            g_al = pltpu.roll(act, s_g, axis=1)          # g-gate -> lanes [0:H]
            o_al = pltpu.roll(act, s_o, axis=1)          # o-gate -> lanes [0:H]
            # Only lanes [0:H] are meaningful; garbage lanes stay bounded (|c| <~ T)
            # and are killed by the zero-padded weight rows downstream.
            c_new = f_al * c_prev + act * g_al           # i-gate already at [0:H]
            h_new = (o_al * jnp.tanh(c_new)).astype(jnp.bfloat16)   # bf16 at production
            return h_new, c_new

        # Layer-0 input contribution for every timestep in one MXU matmul.
        gx0 = jnp.dot(x_ref[...], w_ih0_ref[...],
                      preferred_element_type=jnp.float32) + bias[0]   # (T*Bp, G) f32

        h = [jnp.zeros((Bp, G), jnp.bfloat16) for _ in range(L)]
        c = [jnp.zeros((Bp, G), jnp.float32) for _ in range(L)]

        # Wavefront schedule: at step s, layer l processes t = s - l.  Layer l at t
        # needs layer l-1 at t (written at step s-1) and layer l at t-1.
        for s in range(T + L - 1):
            h_nxt = list(h)
            c_nxt = list(c)
            for l in range(L):
                t = s - l
                if not (0 <= t < T):
                    continue
                if l == 0:
                    g_pre = gx0[t * Bp:(t + 1) * Bp, :] + jnp.dot(
                        h[0], w_hh0, preferred_element_type=jnp.float32)
                else:
                    # Fused input+recurrent matmul: one K=2G MXU push per cell.
                    hh = jnp.concatenate([h[l - 1], h[l]], axis=1)   # (Bp, 2G) bf16
                    g_pre = jnp.dot(hh, w_fused[l - 1],
                                    preferred_element_type=jnp.float32) + bias[l]
                h_nxt[l], c_nxt[l] = cell(g_pre, c[l])
            h, c = h_nxt, c_nxt

        # Final timestep of the last layer -> Linear head (bf16 operands, f32 accum,
        # lane-dense 128-wide store).
        out_ref[...] = (jnp.dot(h[L - 1], fc_w_ref[...],
                                preferred_element_type=jnp.float32) + fc_b_ref[...])

    return kernel


# ------------------------- wrapper (jitted) --------------------------------------

@functools.partial(jax.jit,
                   static_argnames=("num_layers", "hidden_size", "num_classes",
                                    "roll_shifts"))
def _lstm_forward_impl(x, params, *, num_layers, hidden_size, num_classes, roll_shifts):
    B, T, I0 = x.shape
    H = hidden_size
    L = num_layers
    G = 4 * H
    Bp = ((B + 7) // 8) * 8                          # full-sublane batch
    Cp = ((num_classes + 127) // 128) * 128          # lane-dense FC output
    f32, bf16 = jnp.float32, jnp.bfloat16

    # Time-major, batch-padded, flattened input: row index = t*Bp + b.
    x_p = jnp.zeros((Bp, T, I0), f32).at[:B].set(x.astype(f32))
    x_flat = jnp.transpose(x_p, (1, 0, 2)).reshape(T * Bp, I0).astype(bf16)

    flat_inputs = [x_flat]
    for l in range(L):
        w_ih, w_hh, b_ih, b_hh = params["lstm"][l]
        w_ih_T = jnp.asarray(w_ih, f32).T            # (I_l, G)
        w_hh_T = jnp.asarray(w_hh, f32).T            # (H, G)
        b = (jnp.asarray(b_ih, f32) + jnp.asarray(b_hh, f32))[None, :]   # (1, G)
        if l == 0:
            # h lives in lanes [0:H] of a (Bp, G) state; zero-pad the remaining weight
            # rows so h never needs lane-slicing before the matmul.
            w_hh0_pad = jnp.zeros((G, G), f32).at[:H].set(w_hh_T)
            flat_inputs += [w_ih_T.astype(bf16), w_hh0_pad.astype(bf16), b]
        else:
            # Fused [w_ih; w_hh] RHS matching the lane-concatenated [h[l-1] | h[l]] LHS.
            w_f = jnp.zeros((2 * G, G), f32)
            w_f = w_f.at[:H].set(w_ih_T)             # h[l-1] occupies lanes [0:H]
            w_f = w_f.at[G:G + H].set(w_hh_T)        # h[l]   occupies lanes [G:G+H]
            flat_inputs += [w_f.astype(bf16), b]

    fc_w, fc_b = params["fc"]
    fc_w_pad = (jnp.zeros((G, Cp), f32)
                .at[:H, :num_classes].set(jnp.asarray(fc_w, f32).T)).astype(bf16)
    fc_b_pad = jnp.zeros((1, Cp), f32).at[0, :num_classes].set(jnp.asarray(fc_b, f32))
    flat_inputs += [fc_w_pad, fc_b_pad]

    # Explicit scoped-VMEM limit: resident inputs + gx0 + states + output, with margin.
    def nbytes(a):
        return int(np.prod(a.shape)) * jnp.dtype(a.dtype).itemsize
    resident = (sum(nbytes(a) for a in flat_inputs)
                + 4 * T * Bp * G              # gx0 (f32)
                + L * Bp * G * (2 + 4)        # h (bf16) + c (f32)
                + 4 * Bp * Cp)                # output
    vmem_limit = int(min(max(2 * resident + (4 << 20), 16 << 20), 64 << 20))

    kernel = make_lstm_fc_kernel(L, T, H, Bp, roll_shifts)

    out_pad = pl.pallas_call(
        kernel,
        out_shape=jax.ShapeDtypeStruct((Bp, Cp), jnp.float32),
        in_specs=[pl.BlockSpec(memory_space=pltpu.MemorySpace.VMEM)] * len(flat_inputs),
        out_specs=pl.BlockSpec(memory_space=pltpu.MemorySpace.VMEM),
        compiler_params=pltpu.CompilerParams(vmem_limit_bytes=vmem_limit),
    )(*flat_inputs)
    return out_pad[:B, :num_classes]


def lstm_model_forward(x, params, *, num_layers, hidden_size, num_classes):
    """x: (B, T, input_size) float32.  Returns (B, num_classes) float32."""
    roll_shifts = _detect_roll_shifts(hidden_size)   # cached; runs outside the jit
    return _lstm_forward_impl(x, params, num_layers=num_layers,
                              hidden_size=hidden_size, num_classes=num_classes,
                              roll_shifts=roll_shifts)


# ------------------------- pure-JAX reference ------------------------------------

def lstm_model_reference(x, params, *, num_layers, hidden_size):
    B, T, _ = x.shape
    H = hidden_size
    cur = x
    for l in range(num_layers):
        w_ih, w_hh, b_ih, b_hh = params["lstm"][l]
        h = jnp.zeros((B, H), jnp.float32)
        c = jnp.zeros((B, H), jnp.float32)
        hs = []
        for t in range(T):
            g = cur[:, t, :] @ w_ih.T + b_ih + h @ w_hh.T + b_hh
            i_g = jax.nn.sigmoid(g[:, 0 * H:1 * H])
            f_g = jax.nn.sigmoid(g[:, 1 * H:2 * H])
            g_g = jnp.tanh(g[:, 2 * H:3 * H])
            o_g = jax.nn.sigmoid(g[:, 3 * H:4 * H])
            c = f_g * c + i_g * g_g
            h = o_g * jnp.tanh(c)
            hs.append(h)
        cur = jnp.stack(hs, axis=1)
    fc_w, fc_b = params["fc"]
    return cur[:, -1, :] @ fc_w.T + fc_b


# ------------------------- param init (deterministic) ------------------------------

def init_params(key, input_size, hidden_size, num_layers, num_classes):
    k = 1.0 / np.sqrt(hidden_size)
    params = {"lstm": [], "fc": None}
    for l in range(num_layers):
        i_l = input_size if l == 0 else hidden_size
        key, k1, k2, k3, k4 = jax.random.split(key, 5)
        w_ih = jax.random.uniform(k1, (4 * hidden_size, i_l), jnp.float32, -k, k)
        w_hh = jax.random.uniform(k2, (4 * hidden_size, hidden_size), jnp.float32, -k, k)
        b_ih = jax.random.uniform(k3, (4 * hidden_size,), jnp.float32, -k, k)
        b_hh = jax.random.uniform(k4, (4 * hidden_size,), jnp.float32, -k, k)
        params["lstm"].append((w_ih, w_hh, b_ih, b_hh))
    key, k1, k2 = jax.random.split(key, 3)
    fc_w = jax.random.uniform(k1, (num_classes, hidden_size), jnp.float32, -k, k)
    fc_b = jax.random.uniform(k2, (num_classes,), jnp.float32, -k, k)
    params["fc"] = (fc_w, fc_b)
    return params


# ------------------------- main ----------------------------------------------------

if __name__ == "__main__":
    batch, seq_len = 2, 8
    input_size, hidden_size, num_layers, num_classes = 16, 32, 2, 4

    key = jax.random.PRNGKey(0)
    key, kx = jax.random.split(key)
    x = jax.random.normal(kx, (batch, seq_len, input_size), jnp.float32)

    params = init_params(key, input_size, hidden_size, num_layers, num_classes)

    out = lstm_model_forward(x, params, num_layers=num_layers,
                             hidden_size=hidden_size, num_classes=num_classes)
    out = jax.block_until_ready(out)

    ref = lstm_model_reference(x, params, num_layers=num_layers,
                               hidden_size=hidden_size)
    # bf16 MXU operands with f32 accumulation -> 2e-2 tolerance is appropriate.
    np.testing.assert_allclose(np.asarray(out), np.asarray(ref),
                               rtol=2e-2, atol=2e-2)

    print("KERNEL_OK")
</pallas_src>

<mosaic_0001>
module attributes {stable_mosaic.version = 11 : i64} {
  func.func @probe_kernel(%arg0: memref<8x128xf32, #tpu.memory_space<vmem>>, %arg1: memref<8x128xf32, #tpu.memory_space<vmem>>) attributes {dimension_semantics = [], scalar_prefetch = 0 : i64, scratch_operands = 0 : i64, tpu.core_type = #tpu.core_type<tc>} {
    %c0 = arith.constant 0 : index
    %c0_0 = arith.constant 0 : index
    %0 = vector.load %arg0[%c0, %c0_0] : memref<8x128xf32, #tpu.memory_space<vmem>>, vector<8x128xf32>
    %c1_i32 = arith.constant 1 : i32
    %1 = tpu.dynamic_rotate %0 by %c1_i32 dim 1 : vector<8x128xf32>, i32 -> vector<8x128xf32>
    %c0_1 = arith.constant 0 : index
    %c0_2 = arith.constant 0 : index
    %2 = vector.load %arg1[%c0_1, %c0_2] : memref<8x128xf32, #tpu.memory_space<vmem>>, vector<8x128xf32>
    tpu.vector_store %arg1[%c0_1, %c0_2], %1 {strides = array<i32>} : memref<8x128xf32, #tpu.memory_space<vmem>>, vector<8x128xf32>,
    return
  }
}

</mosaic_0001>

<bundles_post_ra>
// kernel: tpu_custom_call.1
= control target key start
LH: loop header
LB: loop body
LE: loop exit
PB: predicated region body
PF: predicated region fallthrough
CT: control target
= control target key end

     0   :  { %6 = vsyncpa [#allocation3], 0  ;;  %s118_s0 = inlined_call_operand.hbm [shape: f32[8,128], index: 0, kind: input, shape index: {}]   ;;  %s119_s1 = inlined_call_operand.hbm [shape: f32[8,128], index: 1, kind: output, shape index: {}]  }
   0x1   :  { %7 = vsyncpa [#allocation4], 0  ;;  %s13_s8 = sshll.u32 %s118_s0, 4  ;;  %s99_s9 = smov [#allocation2]   ;;  %s14_s8 = int_to_ptr.hbm [resolvable:$true] %s13_s8 }
   0x2   :  { %s15_s10 = sshll.u32 %s99_s9, 4  ;;  %s16_s10 = int_to_ptr.vmem [resolvable:$true] %s15_s10 }
   0x3   :  { %18 = dma.hbm_to_vmem [thread:$0]  %s14_s8, 128, %s16_s10, [#allocation3]  }
   0x4   :  { %95 = dma.done.wait [#allocation3], 128  }
   0x5   :  { %96 = vsyncadd [#allocation3], 4294967168  ;;  %v23_v0 = vld [vmem:[#allocation2] sm:$0xff]  ;;  %s100_s11 = smov 1   ;;  %s101_s12 = smov [#allocation5]  }
   0x6   :  { %24 = vrot.lane.b32.xlu0 %v23_v0, %s100_s11  ;;  %s32_s13 = sshll.u32 %s101_s12, 4  ;;  %s34_s16 = sshll.u32 %s119_s1, 4  ;;  %s33_s13 = int_to_ptr.vmem [resolvable:$true] %s32_s13  ;;  %s35_s16 = int_to_ptr.hbm [resolvable:$true] %s34_s16 }
  0x78   :  { %v25_v1 = vpop.permute.xlu0 %24 }
  0x79   :  { %26 = vst [vmem:[#allocation5] sm:$0xff] %v25_v1 }
  0x7a   :  { %37 = dma.vmem_to_hbm [thread:$0]  %s33_s13, 128, %s35_s16, [#allocation4]  }
  0x7b   :  { %97 = dma.done.wait [#allocation4], 128  }
  0x7c   :  { %98 = vsyncadd [#allocation4], 4294967168 }
  0x7d   :  { %42 = vsyncpa [#allocation3], 1 }
  0x7e   :  { %43 = vsyncpa [#allocation4], 1 }

</bundles_post_ra>
